<compile_context>
chip_gen: v6e
topology: v6e:2x2x1
jax: 0.10.0
libtpu: 0.0.40
codegen_flags: <defaults>
</compile_context>

<pallas_src>
import functools

import jax
import jax.numpy as jnp
from jax.experimental import pallas as pl
from jax.experimental.pallas import tpu as pltpu


def _rmsnorm_kernel(x_ref, w_ref, o_ref, *, eps):
    # x_ref: (TM, D) tile of rows, w_ref: (1, D) weight, o_ref: (TM, D) output.
    x = x_ref[...]
    x_f32 = x.astype(jnp.float32)                              # x.float()
    ms = jnp.mean(x_f32 * x_f32, axis=-1, keepdims=True)       # mean(x^2, -1)
    inv = jax.lax.rsqrt(ms + eps)                              # rsqrt(mean + eps)
    normed = (x_f32 * inv).astype(x.dtype)                     # .type_as(x)
    # weight * normed: compute in f32, store in the promoted output dtype.
    out = w_ref[...].astype(jnp.float32) * normed.astype(jnp.float32)
    o_ref[...] = out.astype(o_ref.dtype)


def _round_up(v, m):
    return ((v + m - 1) // m) * m


def _vmem_capacity_bytes():
    """Physical VMEM per TensorCore; safe fallback if the query is unavailable."""
    try:
        return int(pltpu.get_tpu_info().vmem_capacity_bytes)
    except Exception:
        return 64 << 20  # v7x-conservative fallback


def _default_vmem_budget(capacity_bytes):
    # ~1/3 of capacity: ~21 MiB on v7x, ~42 MiB on v5e/v6e.
    return max(capacity_bytes // 3, 8 << 20)


def _pick_row_tile(n_rows, dim, x_dtype, out_dtype, vmem_budget_bytes):
    """Pick a row tile sized against a VMEM budget.

    Accounts for the double-buffered in/out tiles (BlockSpec auto-pipelining)
    plus the f32 intermediates the kernel body materializes (x_f32, x_f32^2).
    """
    x_bytes = jnp.dtype(x_dtype).itemsize
    o_bytes = jnp.dtype(out_dtype).itemsize
    # Sublane packing: 8 rows/vreg for 32-bit, 16 for 16-bit, 32 for 8-bit.
    sub = 8 if x_bytes >= 4 else (16 if x_bytes == 2 else 32)

    bytes_per_row = dim * (2 * (x_bytes + o_bytes) + 2 * 4)
    tm = max(sub, vmem_budget_bytes // bytes_per_row)
    tm = max(sub, (tm // sub) * sub)                   # multiple of sublane pack
    tm = min(tm, _round_up(n_rows, sub))               # don't exceed the data
    # Keep >= ~8 grid steps when possible (>= 4 per TensorCore on v7x megacore)
    # so DMA-in / compute / DMA-out overlap across steps on every generation.
    min_steps = 8
    if n_rows >= min_steps * sub:
        tm = min(tm, _round_up(pl.cdiv(n_rows, min_steps), sub))
    return int(max(tm, sub))


def rmsnorm(x, weight, eps=1e-6, row_tile=None, vmem_budget_bytes=None):
    """RMSNorm over the last axis of x, matching the PyTorch module semantics."""
    orig_shape = x.shape
    dim = orig_shape[-1]
    assert weight.shape == (dim,)

    # Flatten leading dims to rows (no data movement for contiguous layouts).
    n_rows = 1
    for s in orig_shape[:-1]:
        n_rows *= s
    x2 = x.reshape(n_rows, dim)
    w2 = weight.reshape(1, dim)

    # Output dtype follows torch promotion of weight * (x-dtype normed):
    # bf16 weight + bf16 x -> bf16 output; f32 weight -> f32 output.
    out_dtype = jnp.promote_types(weight.dtype, x.dtype)

    capacity = _vmem_capacity_bytes()
    budget = (vmem_budget_bytes if vmem_budget_bytes is not None
              else _default_vmem_budget(capacity))

    tm = row_tile if row_tile is not None else _pick_row_tile(
        n_rows, dim, x2.dtype, out_dtype, budget)

    # Ragged last block is handled by Pallas (padded reads, masked writes) —
    # no host-side pad/concat/slice, which would double HBM traffic.
    grid = (pl.cdiv(n_rows, tm),)

    # Scoped-VMEM limit: double-buffered in/out tiles + f32 intermediates
    # (x_f32 and its square) + weight, plus headroom, clamped below physical
    # capacity so it is valid on v7x (64 MiB) as well as v5e/v6e (128 MiB).
    x_bytes = jnp.dtype(x2.dtype).itemsize
    o_bytes = jnp.dtype(out_dtype).itemsize
    tile_bytes = (2 * tm * dim * (x_bytes + o_bytes)   # pipelined in + out
                  + 2 * tm * dim * 4                   # f32 intermediates
                  + 2 * dim * 4)                       # weight (resident)
    vmem_limit = int(min(max(tile_bytes + (4 << 20), 16 << 20),
                         max(capacity - (8 << 20), 16 << 20)))

    kernel = functools.partial(_rmsnorm_kernel, eps=eps)
    out = pl.pallas_call(
        kernel,
        out_shape=jax.ShapeDtypeStruct((n_rows, dim), out_dtype),
        grid_spec=pltpu.PrefetchScalarGridSpec(
            num_scalar_prefetch=0,
            grid=grid,
            in_specs=[
                pl.BlockSpec((tm, dim), lambda i: (i, 0)),
                pl.BlockSpec((1, dim), lambda i: (0, 0)),  # weight stays VMEM-resident
            ],
            out_specs=pl.BlockSpec((tm, dim), lambda i: (i, 0)),
        ),
        compiler_params=pltpu.CompilerParams(
            dimension_semantics=("parallel",),
            vmem_limit_bytes=vmem_limit,
        ),
    )(x2, w2)

    return out.reshape(orig_shape[:-1] + (dim,))


def rmsnorm_reference(x, weight, eps=1e-6):
    x_f32 = x.astype(jnp.float32)
    inv = jax.lax.rsqrt(jnp.mean(x_f32 * x_f32, axis=-1, keepdims=True) + eps)
    normed = (x_f32 * inv).astype(x.dtype)
    # jnp promotion (bf16*bf16->bf16, f32*bf16->f32) matches torch here.
    return weight * normed


if __name__ == "__main__":
    key = jax.random.PRNGKey(0)

    # Primary test: matches the module's expected usage (batch, seq, hidden).
    batch, seq, hidden = 2, 8, 32
    x = jax.random.normal(key, (batch, seq, hidden), dtype=jnp.float32)
    weight = jnp.ones((hidden,), dtype=jnp.float32)  # nn.Parameter(torch.ones(dim))

    out = rmsnorm(x, weight, eps=1e-6)
    out = jax.block_until_ready(out)
    ref = rmsnorm_reference(x, weight, eps=1e-6)
    assert out.shape == x.shape
    assert out.dtype == ref.dtype
    assert jnp.allclose(out, ref, atol=1e-5, rtol=1e-5)

    # Ragged-row-count test: exercises the padded-read / masked-write last block
    # (no host-side pad or slice around the pallas_call).
    k1, k2, k3 = jax.random.split(key, 3)
    x_rag = jax.random.normal(k1, (3, 5, hidden), dtype=jnp.float32)
    out_rag = jax.block_until_ready(rmsnorm(x_rag, weight, eps=1e-6))
    ref_rag = rmsnorm_reference(x_rag, weight, eps=1e-6)
    assert jnp.allclose(out_rag, ref_rag, atol=1e-5, rtol=1e-5)

    # bf16 input + f32 weight: output promotes to f32, like torch.
    x_bf16 = jax.random.normal(k2, (2, 7, hidden), dtype=jnp.bfloat16)
    out_bf = jax.block_until_ready(rmsnorm(x_bf16, weight, eps=1e-6))
    ref_bf = rmsnorm_reference(x_bf16, weight, eps=1e-6)
    assert out_bf.dtype == jnp.float32
    assert jnp.allclose(out_bf, ref_bf, atol=1e-2, rtol=1e-2)

    # bf16 input + bf16 weight (deployed Mistral config): bf16 output,
    # halving write traffic vs. the previous forced-f32 output.
    w_bf16 = (jnp.ones((hidden,), dtype=jnp.float32)
              + 0.1 * jax.random.normal(k3, (hidden,))).astype(jnp.bfloat16)
    x_bf16b = jax.random.normal(k3, (2, 8, hidden), dtype=jnp.bfloat16)
    out_bb = jax.block_until_ready(rmsnorm(x_bf16b, w_bf16, eps=1e-6))
    ref_bb = rmsnorm_reference(x_bf16b, w_bf16, eps=1e-6)
    assert out_bb.dtype == jnp.bfloat16
    assert jnp.allclose(out_bb.astype(jnp.float32), ref_bb.astype(jnp.float32),
                        atol=2e-2, rtol=2e-2)

    print("KERNEL_OK")
</pallas_src>

<mosaic_0001>
module attributes {stable_mosaic.version = 11 : i64} {
  func.func @_rmsnorm_kernel(%arg0: i32, %arg1: memref<16x32xf32, #tpu.memory_space<vmem>>, %arg2: memref<1x32xf32, #tpu.memory_space<vmem>>, %arg3: memref<16x32xf32, #tpu.memory_space<vmem>>) attributes {dimension_semantics = [#tpu.dimension_semantics<parallel>], iteration_bounds = array<i64: 1>, scalar_prefetch = 0 : i64, scratch_operands = 0 : i64, tpu.core_type = #tpu.core_type<tc>, window_params = [{transform_indices = @transform_0, window_bounds = array<i64: 16, 32>}, {pipeline_mode = #tpu.pipeline_mode<synchronous>, transform_indices = @transform_1, window_bounds = array<i64: 1, 32>}, {transform_indices = @transform_2, window_bounds = array<i64: 16, 32>}]} {
    %c0 = arith.constant 0 : index
    %c0_0 = arith.constant 0 : index
    %0 = vector.load %arg1[%c0, %c0_0] : memref<16x32xf32, #tpu.memory_space<vmem>>, vector<16x32xf32>
    %1 = arith.mulf %0, %0 : vector<16x32xf32>
    %cst = arith.constant dense<0.000000e+00> : vector<16xf32>
    %2 = vector.multi_reduction <add>, %1, %cst [1] : vector<16x32xf32> to vector<16xf32>
    %3 = vector.shape_cast %2 : vector<16xf32> to vector<16x1xf32>
    %cst_1 = arith.constant 3.200000e+01 : f32
    %4 = vector.broadcast %cst_1 : f32 to vector<16x1xf32>
    %5 = arith.divf %3, %4 : vector<16x1xf32>
    %cst_2 = arith.constant 9.99999997E-7 : f32
    %6 = vector.broadcast %cst_2 : f32 to vector<16x1xf32>
    %7 = arith.addf %5, %6 : vector<16x1xf32>
    %8 = math.rsqrt %7 : vector<16x1xf32>
    %9 = vector.broadcast %8 : vector<16x1xf32> to vector<16x32xf32>
    %10 = arith.mulf %0, %9 : vector<16x32xf32>
    %c0_3 = arith.constant 0 : index
    %c0_4 = arith.constant 0 : index
    %11 = vector.load %arg2[%c0_3, %c0_4] : memref<1x32xf32, #tpu.memory_space<vmem>>, vector<1x32xf32>
    %12 = vector.broadcast %11 : vector<1x32xf32> to vector<16x32xf32>
    %13 = arith.mulf %12, %10 : vector<16x32xf32>
    %c0_5 = arith.constant 0 : index
    %c0_6 = arith.constant 0 : index
    %14 = vector.load %arg3[%c0_5, %c0_6] : memref<16x32xf32, #tpu.memory_space<vmem>>, vector<16x32xf32>
    tpu.vector_store %arg3[%c0_5, %c0_6], %13 {strides = array<i32>} : memref<16x32xf32, #tpu.memory_space<vmem>>, vector<16x32xf32>,
    return
  }
  func.func @transform_0(%arg0: i32) -> (i32, i32) {
    %c0_i32 = arith.constant 0 : i32
    %c0_i32_0 = arith.constant 0 : i32
    return %arg0, %c0_i32 : i32, i32
  }
  func.func @transform_1(%arg0: i32) -> (i32, i32) {
    %c0_i32 = arith.constant 0 : i32
    %c0_i32_0 = arith.constant 0 : i32
    %c0_i32_1 = arith.constant 0 : i32
    return %c0_i32, %c0_i32_0 : i32, i32
  }
  func.func @transform_2(%arg0: i32) -> (i32, i32) {
    %c0_i32 = arith.constant 0 : i32
    %c0_i32_0 = arith.constant 0 : i32
    return %arg0, %c0_i32 : i32, i32
  }
}

</mosaic_0001>

<bundles_post_ra>
// kernel: tpu_custom_call.1
= control target key start
LH: loop header
LB: loop body
LE: loop exit
PB: predicated region body
PF: predicated region fallthrough
CT: control target
= control target key end

     0   :  { %7 = vsyncpa [#allocation3], 0  ;;  %s165_s0 = inlined_call_operand.hbm [shape: f32[16,32], index: 0, kind: input, shape index: {}]   ;;  %s166_s1 = inlined_call_operand.vmem [shape: f32[1,32], index: 1, kind: input, shape index: {}]   ;;  %s167_s2 = inlined_call_operand.hbm [shape: f32[16,32], index: 2, kind: output, shape index: {}]  }
   0x1   :  { %8 = vsyncpa [#allocation4], 0  ;;  %s127_s9 = smov [#allocation2]  }
   0x2   :  { %s14_s10 = sshll.u32 %s127_s9, 4  ;;  %s15_s10 = int_to_ptr.vmem [resolvable:$true] %s14_s10 }
   0x3   :  { %s91_s11 = scalar_lea.vmem %s15_s10, 256  ;;  %p96_p1 = scmp.lt.s32.totalorder %s15_s10, %s15_s10 }
   0x4   :  { %p92_p0 = scmp.ne.s32.totalorder %s15_s10, %s91_s11  ;;  %p97_p2 = scmp.lt.s32.totalorder %s91_s11, %s91_s11 }
   0x6   :  { %p98_p3 = por %p97_p2, %p96_p1 }
   0x8   :  { %p99_p4 = pnand %p98_p3, %p92_p0 }
   0xa   :  { %102 = shalt.err (!%p99_p4)
}
   0xb   :  { %s128_s12 = smov 128   ;;  %s129_s13 = smov 8  }
   0xc   :  { %20 = dma.hbm_to_vmem [thread:$0]  %s165_s0, 256, %s15_s10, [#allocation3], %s128_s12, %s128_s12, %s129_s13  }
   0xd   :  { %123 = dma.done.wait [#allocation3], 256  }
   0xe   :  { %124 = vsyncadd [#allocation3], 4294967040  ;;  %v26_v0 = vld [vmem:[#allocation2] sm:$0xff]  ;;  %vm30_vm0 = vcmask 261120   ;;  %v27_v1 = vld [vmem:[#allocation2 + $0x8] sm:$0xff]  ;;  %s130_s17 = smov [#allocation5]  }
   0xf   :  { %v28_v2 = vmul.f32 %v26_v0, %v26_v0  ;;  %v29_v3 = vmul.f32 %v27_v1, %v27_v1  ;;  %v74_v13 = vld [vmem:[%s166_s1] ss:$0 sm:$0xff]  ;;  %s62_s18 = sshll.u32 %s130_s17, 4  ;;  %s63_s18 = int_to_ptr.vmem [resolvable:$true] %s62_s18 }
  0x10   :  { %s103_s19 = scalar_lea.vmem %s63_s18, 256  ;;  %p108_p6 = scmp.lt.s32.totalorder %s63_s18, %s63_s18 }
  0x11   :  { %v31_v4 = vsel %vm30_vm0, %v28_v2, 0.0  ;;  %v34_v5 = vsel %vm30_vm0, %v29_v3, 0.0  ;;  %p104_p5 = scmp.ne.s32.totalorder %s63_s18, %s103_s19  ;;  %p109_p7 = scmp.lt.s32.totalorder %s103_s19, %s103_s19 }
  0x12   :  { %32 = vadd.xlane.f32.xlu0 %v31_v4 }
  0x13   :  { %p110_p8 = por %p109_p7, %p108_p6 }
  0x15   :  { %p111_p9 = pnand %p110_p8, %p104_p5 }
  0x16   :  { %35 = vadd.xlane.f32.xlu0 %v34_v5 }
  0x9b   :  { %v33_v6 = vpop.xlane.xlu0 %32 }
  0x9c   :  { %v38_v7 = vmul.f32 0.03125, %v33_v6 }
  0x9e   :  { %v40_v8 = vadd.f32 1e-06, %v38_v7 }
  0x9f   :  { %v36_v9 = vpop.xlane.xlu0 %35 }
  0xa0   :  { %79 = vrsqrt.f32 %v40_v8  ;;  %v39_v10 = vmul.f32 0.03125, %v36_v9 }
  0xa2   :  { %v41_v11 = vadd.f32 1e-06, %v39_v10 }
  0xa4   :  { %81 = vrsqrt.f32 %v41_v11 }
  0xad   :  { %v80_v12 = vpop.eup %79 }
  0xae   :  { %v44_v14 = vmul.f32 %v80_v12, %v26_v0 }
  0xb0   :  { %v53_v15 = vmul.f32 %v74_v13, %v44_v14 }
  0xb1   :  { %v82_v16 = vpop.eup %81 }
  0xb2   :  { %v45_v17 = vmul.f32 %v82_v16, %v27_v1  ;;  %55 = vst.msk [vmem:[#allocation5] sm:$0xff] %vm30_vm0, %v53_v15 }
  0xb4   :  { %v54_v18 = vmul.f32 %v74_v13, %v45_v17 }
  0xb6   :  { %56 = vst.msk [vmem:[#allocation5 + $0x8] sm:$0xff] %vm30_vm0, %v54_v18 }
  0xb7   :  { %114 = shalt.err (!%p111_p9)
}
  0xb8   :  { %68 = dma.vmem_to_hbm [thread:$0]  %s63_s18, 256, %s167_s2, [#allocation4], %s128_s12, %s128_s12, %s129_s13  }
  0xb9   :  { %125 = dma.done.wait [#allocation4], 256  }
  0xba   :  { %126 = vsyncadd [#allocation4], 4294967040 }
  0xbb   :  { %72 = vsyncpa [#allocation3], 1 }
  0xbc   :  { %73 = vsyncpa [#allocation4], 1 }

</bundles_post_ra>
